<compile_context>
chip_gen: v5e
topology: v5e:2x2
jax: 0.10.0
libtpu: 0.0.40
codegen_flags: <defaults>
</compile_context>

<pallas_src>
import functools

import jax
import jax.numpy as jnp
import numpy as np
from jax import lax
from jax.experimental import pallas as pl
from jax.experimental.pallas import tpu as pltpu


def _mha_kernel(x_ref, wqkv_ref, wp_ref, bp_ref, o_ref, cat_ref,
                *, num_heads, head_size, embed_dim):
    H, hs, C = num_heads, head_size, embed_dim
    x = x_ref[...]                                   # (T, C) block for this batch element
    T = x.shape[0]

    scale = embed_dim ** -0.5                        # NOTE: C**-0.5 (not hs**-0.5), per the module.

    # Fused, head-batched QKV projection: (H, T, C) @ (H, C, 3*hs) -> (H, T, 3*hs)
    xh = jnp.broadcast_to(x[None, :, :], (H, T, C))
    qkv = jnp.einsum('htc,hcd->htd', xh, wqkv_ref[...],
                     preferred_element_type=jnp.float32)
    q = qkv[..., 0:hs] * scale                       # scale folded into q (T*E elems, not H*T*T)
    k = qkv[..., hs:2 * hs]
    v = qkv[..., 2 * hs:3 * hs]

    # Causal (tril) mask, built in-kernel, broadcast over heads.
    row = lax.broadcasted_iota(jnp.int32, (T, T), 0)
    col = lax.broadcasted_iota(jnp.int32, (T, T), 1)
    causal = (col <= row)[None, :, :]                # (1, T, T)

    # All heads in one batched MXU push per stage.
    s = jnp.einsum('hqd,hkd->hqk', q, k, preferred_element_type=jnp.float32)  # (H, T, T)
    s = jnp.where(causal, s, -jnp.inf)
    # Numerically-stable softmax over the last dim (each row has >=1 unmasked entry).
    s = s - jnp.max(s, axis=-1, keepdims=True)
    p = jnp.exp(s)
    p = p * pl.reciprocal(jnp.sum(p, axis=-1, keepdims=True), approx=True)
    # TODO(synk): attention-dropout (p=0.2) skipped — eval-mode identity.

    o = jnp.einsum('hqk,hkd->hqd', p, v, preferred_element_type=jnp.float32)  # (H, T, hs)

    # No jnp.concatenate: write each head's output into its (T, C) scratch slice,
    # then do a single K=C projection matmul.
    for h in range(H):
        cat_ref[:, h * hs:(h + 1) * hs] = o[h]

    proj = jnp.dot(cat_ref[...], wp_ref[...],
                   preferred_element_type=jnp.float32) + bp_ref[...]
    # TODO(synk): multi-head dropout (p=0.2) skipped — eval-mode identity.
    o_ref[...] = proj.astype(o_ref.dtype)


def multi_head_attention(x, wq, wk, wv, wp, bp, *, num_heads, head_size):
    """x: (B, T, C); wq/wk/wv: (C, H*hs) head-major columns; wp: (C, C); bp: (1, C)."""
    B, T, C = x.shape
    H, hs = num_heads, head_size
    assert H * hs == C, "num_heads * head_size must equal embed_dim (concat -> proj)"

    # Wrapper-side layout plumbing (pure XLA): fuse Q/K/V into one per-head-stacked
    # weight of shape (H, C, 3*hs): head h columns are [Wq_h | Wk_h | Wv_h].
    wq_h = wq.reshape(C, H, hs).transpose(1, 0, 2)   # (H, C, hs)
    wk_h = wk.reshape(C, H, hs).transpose(1, 0, 2)
    wv_h = wv.reshape(C, H, hs).transpose(1, 0, 2)
    wqkv = jnp.concatenate([wq_h, wk_h, wv_h], axis=-1)   # (H, C, 3*hs)

    # Lane/sublane-dense slabs: (B*T, C) with (T, C) blocks (no leading size-1 dims).
    x2 = x.reshape(B * T, C)

    kernel = functools.partial(
        _mha_kernel, num_heads=H, head_size=hs, embed_dim=C)

    out2 = pl.pallas_call(
        kernel,
        out_shape=jax.ShapeDtypeStruct((B * T, C), x.dtype),
        grid_spec=pltpu.PrefetchScalarGridSpec(
            num_scalar_prefetch=0,
            grid=(B,),                                       # 2 parallel steps (v7x: both TCs)
            in_specs=[
                pl.BlockSpec((T, C), lambda b: (b, 0)),          # x slab  (per-batch tile)
                pl.BlockSpec((H, C, 3 * hs), lambda b: (0, 0, 0)),  # fused QKV weight (resident)
                pl.BlockSpec((C, C), lambda b: (0, 0)),          # Wproj (resident)
                pl.BlockSpec((1, C), lambda b: (0, 0)),          # bproj (resident)
            ],
            out_specs=pl.BlockSpec((T, C), lambda b: (b, 0)),
            scratch_shapes=[pltpu.VMEM((T, C), jnp.float32)],    # concat slab (per-step reuse)
        ),
        compiler_params=pltpu.CompilerParams(
            dimension_semantics=("parallel",)),
    )(x2, wqkv, wp, bp)

    return out2.reshape(B, T, C)


def _reference(x, wq, wk, wv, wp, bp, *, num_heads, head_size):
    """Pure-JAX reference matching the PyTorch forward (eval mode)."""
    B, T, C = x.shape
    q = x @ wq
    k = x @ wk
    v = x @ wv
    mask = np.tril(np.ones((T, T), dtype=bool))
    outs = []
    for h in range(num_heads):
        sl = slice(h * head_size, (h + 1) * head_size)
        wei = (q[..., sl] @ jnp.swapaxes(k[..., sl], -1, -2)) * (C ** -0.5)
        wei = jnp.where(mask, wei, -jnp.inf)
        wei = jax.nn.softmax(wei, axis=-1)
        outs.append(wei @ v[..., sl])
    cat = jnp.concatenate(outs, axis=-1)
    return cat @ wp + bp


if __name__ == "__main__":
    # Small shapes consistent with the module.
    B, T = 2, 8
    num_heads, head_size = 4, 8
    embed_dim = num_heads * head_size           # 32
    block_dim = T                               # tril buffer covers the sequence

    key = jax.random.PRNGKey(0)
    kx, kq, kk, kv, kp, kb = jax.random.split(key, 6)

    x = jax.random.normal(kx, (B, T, embed_dim), dtype=jnp.float32)

    # PyTorch Linear weight shape is (out, in); stored transposed (in, out) so the
    # kernel computes x @ W.  Per-head (head_size, embed_dim) weights are stacked
    # head-major into (embed_dim, num_heads*head_size).
    scale = 0.1
    wq = scale * jax.random.normal(kq, (embed_dim, num_heads * head_size), jnp.float32)
    wk = scale * jax.random.normal(kk, (embed_dim, num_heads * head_size), jnp.float32)
    wv = scale * jax.random.normal(kv, (embed_dim, num_heads * head_size), jnp.float32)
    wp = scale * jax.random.normal(kp, (embed_dim, embed_dim), jnp.float32)
    bp = scale * jax.random.normal(kb, (1, embed_dim), jnp.float32)

    out = multi_head_attention(x, wq, wk, wv, wp, bp,
                               num_heads=num_heads, head_size=head_size)
    out = jax.block_until_ready(out)

    ref = _reference(x, wq, wk, wv, wp, bp,
                     num_heads=num_heads, head_size=head_size)
    # Slightly looser tolerance: the softmax denominator uses the EUP approximate
    # reciprocal (pl.reciprocal(approx=True)) per the performance review.
    np.testing.assert_allclose(np.asarray(out), np.asarray(ref), rtol=1e-2, atol=1e-2)

    print("KERNEL_OK")
</pallas_src>

<mosaic_0001>
module attributes {stable_mosaic.version = 11 : i64} {
  func.func @_mha_kernel(%arg0: i32, %arg1: memref<8x32xf32, #tpu.memory_space<vmem>>, %arg2: memref<4x32x24xf32, #tpu.memory_space<vmem>>, %arg3: memref<32x32xf32, #tpu.memory_space<vmem>>, %arg4: memref<1x32xf32, #tpu.memory_space<vmem>>, %arg5: memref<8x32xf32, #tpu.memory_space<vmem>>, %arg6: memref<8x32xf32, #tpu.memory_space<vmem>>) attributes {dimension_semantics = [#tpu.dimension_semantics<parallel>], iteration_bounds = array<i64: 2>, scalar_prefetch = 0 : i64, scratch_operands = 1 : i64, tpu.core_type = #tpu.core_type<tc>, window_params = [{transform_indices = @transform_0, window_bounds = array<i64: 8, 32>}, {pipeline_mode = #tpu.pipeline_mode<synchronous>, transform_indices = @transform_1, window_bounds = array<i64: 4, 32, 24>}, {pipeline_mode = #tpu.pipeline_mode<synchronous>, transform_indices = @transform_2, window_bounds = array<i64: 32, 32>}, {pipeline_mode = #tpu.pipeline_mode<synchronous>, transform_indices = @transform_3, window_bounds = array<i64: 1, 32>}, {transform_indices = @transform_4, window_bounds = array<i64: 8, 32>}]} {
    %c0 = arith.constant 0 : index
    %c0_0 = arith.constant 0 : index
    %0 = vector.load %arg1[%c0, %c0_0] : memref<8x32xf32, #tpu.memory_space<vmem>>, vector<8x32xf32>
    %1 = vector.shape_cast %0 : vector<8x32xf32> to vector<1x8x32xf32>
    %2 = vector.shape_cast %1 : vector<1x8x32xf32> to vector<1x8x32xf32>
    %3 = vector.broadcast %2 : vector<1x8x32xf32> to vector<4x8x32xf32>
    %c0_1 = arith.constant 0 : index
    %c0_2 = arith.constant 0 : index
    %c0_3 = arith.constant 0 : index
    %4 = vector.load %arg2[%c0_1, %c0_2, %c0_3] : memref<4x32x24xf32, #tpu.memory_space<vmem>>, vector<4x32x24xf32>
    "tpu.trace_start"() <{level = 10 : i32, message = "htc,hcd->htd"}> : () -> ()
    %cst = arith.constant dense<0.000000e+00> : vector<4x8x24xf32>
    %5 = tpu.matmul %3, %4, %cst {dimension_numbers = #tpu.dot_dimension_numbers<[2], [1], [1], [2], [0, 0, 0, 1, 1, 2], [0], [0]>} : vector<4x8x32xf32>, vector<4x32x24xf32>, vector<4x8x24xf32> -> vector<4x8x24xf32>
    "tpu.trace_stop"() : () -> ()
    %6 = vector.extract_strided_slice %5 {offsets = [0, 0, 0], sizes = [4, 8, 8], strides = [1, 1, 1]} : vector<4x8x24xf32> to vector<4x8x8xf32>
    %cst_4 = arith.constant 0.176776692 : f32
    %7 = vector.broadcast %cst_4 : f32 to vector<4x8x8xf32>
    %8 = arith.mulf %6, %7 : vector<4x8x8xf32>
    %9 = vector.extract_strided_slice %5 {offsets = [0, 0, 8], sizes = [4, 8, 8], strides = [1, 1, 1]} : vector<4x8x24xf32> to vector<4x8x8xf32>
    %10 = vector.extract_strided_slice %5 {offsets = [0, 0, 16], sizes = [4, 8, 8], strides = [1, 1, 1]} : vector<4x8x24xf32> to vector<4x8x8xf32>
    %11 = tpu.iota {dimensions = array<i32: 0>} : vector<8x8xi32>
    %12 = tpu.iota {dimensions = array<i32: 1>} : vector<8x8xi32>
    %13 = arith.cmpi sle, %12, %11 : vector<8x8xi32>
    %14 = vector.shape_cast %13 : vector<8x8xi1> to vector<1x8x8xi1>
    "tpu.trace_start"() <{level = 10 : i32, message = "hqd,hkd->hqk"}> : () -> ()
    %cst_5 = arith.constant dense<0.000000e+00> : vector<4x8x8xf32>
    %15 = tpu.matmul %8, %9, %cst_5 {dimension_numbers = #tpu.dot_dimension_numbers<[2], [2], [1], [1], [0, 0, 0, 1, 1, 1], [0], [0]>} : vector<4x8x8xf32>, vector<4x8x8xf32>, vector<4x8x8xf32> -> vector<4x8x8xf32>
    %cst_6 = arith.constant 0xFF800000 : f32
    "tpu.trace_stop"() : () -> ()
    %16 = vector.shape_cast %14 : vector<1x8x8xi1> to vector<1x8x8xi1>
    %17 = vector.broadcast %16 : vector<1x8x8xi1> to vector<4x8x8xi1>
    %18 = vector.broadcast %cst_6 : f32 to vector<4x8x8xf32>
    %19 = arith.select %17, %15, %18 : vector<4x8x8xi1>, vector<4x8x8xf32>
    %cst_7 = arith.constant dense<0xFF800000> : vector<4x8xf32>
    %20 = vector.multi_reduction <maximumf>, %19, %cst_7 [2] : vector<4x8x8xf32> to vector<4x8xf32>
    %21 = vector.shape_cast %20 : vector<4x8xf32> to vector<4x8x1xf32>
    %22 = vector.broadcast %21 : vector<4x8x1xf32> to vector<4x8x8xf32>
    %23 = arith.subf %19, %22 : vector<4x8x8xf32>
    %24 = math.exp %23 : vector<4x8x8xf32>
    %cst_8 = arith.constant dense<0.000000e+00> : vector<4x8xf32>
    %25 = vector.multi_reduction <add>, %24, %cst_8 [2] : vector<4x8x8xf32> to vector<4x8xf32>
    %26 = vector.shape_cast %25 : vector<4x8xf32> to vector<4x8x1xf32>
    %27 = tpu.reciprocal %26 {approx = true} : vector<4x8x1xf32> -> vector<4x8x1xf32>
    %28 = vector.broadcast %27 : vector<4x8x1xf32> to vector<4x8x8xf32>
    %29 = arith.mulf %24, %28 : vector<4x8x8xf32>
    "tpu.trace_start"() <{level = 10 : i32, message = "hqk,hkd->hqd"}> : () -> ()
    %cst_9 = arith.constant dense<0.000000e+00> : vector<4x8x8xf32>
    %30 = tpu.matmul %29, %10, %cst_9 {dimension_numbers = #tpu.dot_dimension_numbers<[2], [1], [1], [2], [0, 0, 0, 1, 1, 2], [0], [0]>} : vector<4x8x8xf32>, vector<4x8x8xf32>, vector<4x8x8xf32> -> vector<4x8x8xf32>
    "tpu.trace_stop"() : () -> ()
    %31 = vector.extract_strided_slice %30 {offsets = [0, 0, 0], sizes = [1, 8, 8], strides = [1, 1, 1]} : vector<4x8x8xf32> to vector<1x8x8xf32>
    %32 = vector.shape_cast %31 : vector<1x8x8xf32> to vector<8x8xf32>
    %c0_10 = arith.constant 0 : index
    %c0_11 = arith.constant 0 : index
    %33 = vector.load %arg6[%c0_10, %c0_11] : memref<8x32xf32, #tpu.memory_space<vmem>>, vector<8x8xf32>
    tpu.vector_store %arg6[%c0_10, %c0_11], %32 {strides = array<i32>} : memref<8x32xf32, #tpu.memory_space<vmem>>, vector<8x8xf32>,
    %34 = vector.extract_strided_slice %30 {offsets = [1, 0, 0], sizes = [1, 8, 8], strides = [1, 1, 1]} : vector<4x8x8xf32> to vector<1x8x8xf32>
    %35 = vector.shape_cast %34 : vector<1x8x8xf32> to vector<8x8xf32>
    %c0_12 = arith.constant 0 : index
    %c8 = arith.constant 8 : index
    %36 = vector.load %arg6[%c0_12, %c8] : memref<8x32xf32, #tpu.memory_space<vmem>>, vector<8x8xf32>
    tpu.vector_store %arg6[%c0_12, %c8], %35 {strides = array<i32>} : memref<8x32xf32, #tpu.memory_space<vmem>>, vector<8x8xf32>,
    %37 = vector.extract_strided_slice %30 {offsets = [2, 0, 0], sizes = [1, 8, 8], strides = [1, 1, 1]} : vector<4x8x8xf32> to vector<1x8x8xf32>
    %38 = vector.shape_cast %37 : vector<1x8x8xf32> to vector<8x8xf32>
    %c0_13 = arith.constant 0 : index
    %c16 = arith.constant 16 : index
    %39 = vector.load %arg6[%c0_13, %c16] : memref<8x32xf32, #tpu.memory_space<vmem>>, vector<8x8xf32>
    tpu.vector_store %arg6[%c0_13, %c16], %38 {strides = array<i32>} : memref<8x32xf32, #tpu.memory_space<vmem>>, vector<8x8xf32>,
    %40 = vector.extract_strided_slice %30 {offsets = [3, 0, 0], sizes = [1, 8, 8], strides = [1, 1, 1]} : vector<4x8x8xf32> to vector<1x8x8xf32>
    %41 = vector.shape_cast %40 : vector<1x8x8xf32> to vector<8x8xf32>
    %c0_14 = arith.constant 0 : index
    %c24 = arith.constant 24 : index
    %42 = vector.load %arg6[%c0_14, %c24] : memref<8x32xf32, #tpu.memory_space<vmem>>, vector<8x8xf32>
    tpu.vector_store %arg6[%c0_14, %c24], %41 {strides = array<i32>} : memref<8x32xf32, #tpu.memory_space<vmem>>, vector<8x8xf32>,
    %c0_15 = arith.constant 0 : index
    %c0_16 = arith.constant 0 : index
    %43 = vector.load %arg6[%c0_15, %c0_16] : memref<8x32xf32, #tpu.memory_space<vmem>>, vector<8x32xf32>
    %c0_17 = arith.constant 0 : index
    %c0_18 = arith.constant 0 : index
    %44 = vector.load %arg3[%c0_17, %c0_18] : memref<32x32xf32, #tpu.memory_space<vmem>>, vector<32x32xf32>
    %cst_19 = arith.constant dense<0.000000e+00> : vector<8x32xf32>
    %45 = tpu.matmul %43, %44, %cst_19 {dimension_numbers = #tpu.dot_dimension_numbers<[1], [0], [0], [1], [0, 0, 1, 1], [], []>} : vector<8x32xf32>, vector<32x32xf32>, vector<8x32xf32> -> vector<8x32xf32>
    %c0_20 = arith.constant 0 : index
    %c0_21 = arith.constant 0 : index
    %46 = vector.load %arg4[%c0_20, %c0_21] : memref<1x32xf32, #tpu.memory_space<vmem>>, vector<1x32xf32>
    %47 = vector.broadcast %46 : vector<1x32xf32> to vector<8x32xf32>
    %48 = arith.addf %45, %47 : vector<8x32xf32>
    %c0_22 = arith.constant 0 : index
    %c0_23 = arith.constant 0 : index
    %49 = vector.load %arg5[%c0_22, %c0_23] : memref<8x32xf32, #tpu.memory_space<vmem>>, vector<8x32xf32>
    tpu.vector_store %arg5[%c0_22, %c0_23], %48 {strides = array<i32>} : memref<8x32xf32, #tpu.memory_space<vmem>>, vector<8x32xf32>,
    return
  }
  func.func @transform_0(%arg0: i32) -> (i32, i32) {
    %c0_i32 = arith.constant 0 : i32
    %c0_i32_0 = arith.constant 0 : i32
    return %arg0, %c0_i32 : i32, i32
  }
  func.func @transform_1(%arg0: i32) -> (i32, i32, i32) {
    %c0_i32 = arith.constant 0 : i32
    %c0_i32_0 = arith.constant 0 : i32
    %c0_i32_1 = arith.constant 0 : i32
    %c0_i32_2 = arith.constant 0 : i32
    return %c0_i32, %c0_i32_0, %c0_i32_1 : i32, i32, i32
  }
  func.func @transform_2(%arg0: i32) -> (i32, i32) {
    %c0_i32 = arith.constant 0 : i32
    %c0_i32_0 = arith.constant 0 : i32
    %c0_i32_1 = arith.constant 0 : i32
    return %c0_i32, %c0_i32_0 : i32, i32
  }
  func.func @transform_3(%arg0: i32) -> (i32, i32) {
    %c0_i32 = arith.constant 0 : i32
    %c0_i32_0 = arith.constant 0 : i32
    %c0_i32_1 = arith.constant 0 : i32
    return %c0_i32, %c0_i32_0 : i32, i32
  }
  func.func @transform_4(%arg0: i32) -> (i32, i32) {
    %c0_i32 = arith.constant 0 : i32
    %c0_i32_0 = arith.constant 0 : i32
    return %arg0, %c0_i32 : i32, i32
  }
}

</mosaic_0001>

<bundles_post_ra>
// kernel: tpu_custom_call.1
= control target key start
LH: loop header
LB: loop body
LE: loop exit
PB: predicated region body
PF: predicated region fallthrough
CT: control target
= control target key end

     0   :  { %9 = vsyncpa [#allocation4], 0  ;;  %s1077_s0 = inlined_call_operand.vmem [shape: f32[16,32], index: 0, kind: input, shape index: {}]   ;;  %s1078_s1 = inlined_call_operand.vmem [shape: f32[4,32,24], index: 1, kind: input, shape index: {}]   ;;  %s1079_s2 = inlined_call_operand.vmem [shape: f32[32,32], index: 2, kind: input, shape index: {}]   ;;  %s1080_s3 = inlined_call_operand.vmem [shape: f32[1,32], index: 3, kind: input, shape index: {}]   ;;  %s1081_s4 = inlined_call_operand.hbm [shape: f32[16,32], index: 4, kind: output, shape index: {}]  }
   0x1   :  { %11 = vsyncpa [#allocation4 + $0x1], 0  ;;  %s884_s15 = smov 0   ;;  %s886_s16 = smov 0  }
   0x2   :  { %s888_s17 = smov 0   ;;  %s890_s18 = smov 0  }
   0x3 LB: > { %s905_s19 = sadd.s32 4294967295, %s852_s18   ;;  %s697_s20 = sadd.s32 4294967294, %s852_s18   ;;  %s852_s18 = sphi %s890_s18, %s1087_s18   ;;  %s848_s17 = sphi %s888_s17, %s1086_s17   ;;  %s844_s16 = sphi %s886_s16, %s1085_s16   ;;  %s840_s15 = sphi %s884_s15, %s1084_s15  }
   0x4   : > { %s909_s21 = sadd.s32 1, %s852_s18   ;;  %s113_s22 = sadd.s32 1, %s848_s17 }
   0x5   : > { %s110_s23 = ssub.s32 %s852_s18, %s909_s21  ;;  %p123_p0 = scmp.ne.s32.totalorder %s848_s17, %s844_s16 }
   0x6   : > { %p111_p1 = scmp.eq.s32.totalorder %s110_s23, 0  ;;  %p124_p2 = scmp.eq.s32.totalorder %s905_s19, 1 }
   0x7   : > { %p129_p3 = scmp.ne.s32.totalorder %s844_s16, %s840_s15  ;;  %p130_p4 = scmp.eq.s32.totalorder %s697_s20, 1 }
   0x8   : > { %s920_s24 = scalar_select %p111_p1, %s848_s17, %s113_s22  }
   0x9   : > { %p922_p5 = por %p124_p2, %p123_p0  ;;  %p926_p6 = por %p130_p4, %p129_p3 }
   0xa   : > { %p700_p7 = scmp.ge.s32.totalorder %s852_s18, 1  ;;  %p164_p8 = scmp.lt.s32.totalorder %s852_s18, 3 }
   0xc   : > { %p165_p9 = pnand %p700_p7, %p164_p8 }
   0xd   : > { %p189_p10 = scmp.lt.s32.totalorder (!%p165_p9), %s905_s19, 1  ;;  %s854_s30 = smov (!%p165_p9), 120  }
   0xe   : > { %168 = sbr.rel (%p165_p9) target bundleno = 1062 (0x426), region = 36  ;;  %s855_s5 = smov (!%p165_p9), 112  }
   0xf   : > { %s856_s6 = smov (!%p165_p9), 8   ;;  %s858_s8 = smov (!%p165_p9), 24  }
  0x10   : > { %s721_s28 = sshll.u32 (!%p165_p9), %s905_s19, 3  ;;  %s810_s20 = scalar_lea.hbm (!%p165_p9), %s1081_s4, 16 }
  0x13   : > { %v201_v0 = vld [vmem:[%s1078_s1 + $0x38] sm:$0xff]  ;;  %v200_v3 = vld [vmem:[%s1078_s1 + $0x30] sm:$0xff]  ;;  %v199_v6 = vld [vmem:[%s1078_s1 + $0x28] sm:$0xff]  ;;  %s190_s23 = scalar_select %p189_p10, %s905_s19, 1  ;;  %vm210_vm0 = vcmask 261120   ;;  %vm306_vm1 = vcmask 64512   ;;  %v298_v29 = vlaneseq }
  0x14   : > { %v205_v1 = vld [vmem:[%s1078_s1 + $0x58] sm:$0xff]  ;;  %246 = vmatpush.msra.mxu1 %v201_v0  ;;  %v204_v4 = vld [vmem:[%s1078_s1 + $0x50] sm:$0xff]  ;;  %v203_v7 = vld [vmem:[%s1078_s1 + $0x48] sm:$0xff]  ;;  %vm575_vm3 = vcmask 130112   ;;  %vm581_vm4 = vcmask 195712   ;;  %vm587_vm5 = vcmask 261312  }
  0x15   : > { %v209_v2 = vld [vmem:[%s1078_s1 + $0x78] sm:$0xff]  ;;  %266 = vmatpush.msra.mxu2 %v205_v1  ;;  %v208_v5 = vld [vmem:[%s1078_s1 + $0x70] sm:$0xff]  ;;  %v207_v8 = vld [vmem:[%s1078_s1 + $0x68] sm:$0xff]  ;;  %s702_s7 = sshll.u32 %s190_s23, 3  ;;  %v299_v30 = vshrl.u32 %v298_v29, 7  ;;  %v301_v31 = vand.u32 127, %v298_v29 }
  0x16   : > { %286 = vmatpush.msra.mxu3 %v209_v2  ;;  %247 = vmatpush.msra.mxu1 %v200_v3  ;;  %v198_v9 = vld [vmem:[%s1078_s1 + $0x20] sm:$0xff]  ;;  %v197_v11 = vld [vmem:[%s1078_s1 + $0x18] sm:$0xff]  ;;  %s192_s14 = scalar_lea.vmem %s1077_s0, %s702_s7  ;;  %v196_v14 = vld [vmem:[%s1078_s1 + $0x10] sm:$0xff]  ;;  %s857_s7 = smov 16  }
  0x17   : > { %267 = vmatpush.msra.mxu2 %v204_v4  ;;  %v202_v10 = vld [vmem:[%s1078_s1 + $0x40] sm:$0xff]  ;;  %226 = vmatpush.msra.mxu0 %v197_v11  ;;  %v195_v15 = vld [vmem:[%s1078_s1 + $0x8] sm:$0xff]  ;;  %vm302_vm2 = vcmp.le.s32.totalorder %v301_v31, %v299_v30  ;;  %s186_s23 = sand.u32 1, %s844_s16  }
  0x18   : > { %287 = vmatpush.msra.mxu3 %v208_v5  ;;  %248 = vmatpush.msra.mxu1 %v199_v6  ;;  %v206_v12 = vld [vmem:[%s1078_s1 + $0x60] sm:$0xff]  ;;  %s701_s27 = sshll.u32 %s186_s23, 3  ;;  %s623_s11 = scalar_lea.sflag [#allocation4], %s186_s23 }
  0x19   : > { %268 = vmatpush.msra.mxu2 %v203_v7  ;;  %v193_v13 = vld [vmem:[%s192_s14] sm:$0xff]  ;;  %227 = vmatpush.msra.mxu0 %v196_v14 }
  0x1a   : > { %288 = vmatpush.msra.mxu3 %v207_v8  ;;  %249 = vmatpush.msra.mxu1 %v198_v9  ;;  %v194_v16 = vld [vmem:[%s1078_s1] sm:$0xff] }
  0x1b   : > { %269 = vmatpush.msra.mxu2 %v202_v10  ;;  %704 = vmatmul.msk.f32.vlgmr.msra.gmra.mxu1 %vm210_vm0, %v193_v13  ;;  %v773_v30 = vld [vmem:[%s1080_s3] ss:$0 sm:$0xff] }
  0x1c   : > { %289 = vmatpush.msra.mxu3 %v206_v12  ;;  %705 = vmatmul.msk.f32.vlgmr.msra.gmra.mxu2 %vm210_vm0, %v193_v13 }
  0x1d   : > { %706 = vmatmul.msk.f32.vlgmr.msra.gmra.mxu3 %vm210_vm0, %v193_v13  ;;  %228 = vmatpush.msra.mxu0 %v195_v15 }
  0x1f   : > { %229 = vmatpush.msra.mxu0 %v194_v16 }
  0x20   : > { %703 = vmatmul.msk.f32.vlgmr.msra.gmra.mxu0 %vm210_vm0, %v193_v13 }
  0x98   : > { %v251_v17 = vpop.f32.mrf.mxu1 }
  0x99   : > { %333 = vrot.lane.b32.xlu1 %v251_v17, %s854_s30  ;;  %v295_v22 = vmul.f32 0.17677669, %v251_v17 }
  0x9d   : > { %v992_v19 = vpop.f32.mrf.mxu0 }
  0x9e   : > { %v294_v24 = vmul.f32 0.17677669, %v992_v19 }
  0x9f   : > { %v989_v18 = vpop.f32.mrf.mxu2 }
  0xa0   : > { %361 = vrot.lane.b32.xlu0 %v989_v18, %s854_s30  ;;  %v995_v20 = vpop.f32.mrf.mxu3  ;;  %v296_v26 = vmul.f32 0.17677669, %v989_v18 }
  0xa1   : > { %304 = vrot.lane.b32.xlu1 %v992_v19, %s854_s30  ;;  %v297_v28 = vmul.f32 0.17677669, %v995_v20  ;;  %v768_v1 = vpack.i.bf16 %v995_v20, %v989_v18 }
  0xa8   : > { %389 = vrot.lane.b32.xlu0 %v995_v20, %s854_s30 }
 0x10b   : > { %v334_v21 = vpop.permute.xlu1 %333 }
 0x10c   : > { %709 = vmatpush.xpose.msk.msrb.mxu1 %vm306_vm1, %v334_v21 }
 0x10f   : > { %710 = vmatmul.msk.f32.vlgmr.msrb.gmra.mxu1 %vm306_vm1, %v295_v22  ;;  %v593_v22 = vld [vmem:[%s1079_s2 + $0x18] sm:$0xff] }
 0x112   : > { %v362_v23 = vpop.permute.xlu0 %361 }
 0x113   : > { %711 = vmatpush.xpose.msk.msrb.mxu2 %vm306_vm1, %v362_v23  ;;  %v305_v25 = vpop.permute.xlu1 %304  ;;  %v592_v23 = vld [vmem:[%s1079_s2 + $0x10] sm:$0xff] }
 0x114   : > { %707 = vmatpush.xpose.msk.msrb.mxu0 %vm306_vm1, %v305_v25  ;;  %v591_v25 = vld [vmem:[%s1079_s2 + $0x8] sm:$0xff] }
 0x116   : > { %712 = vmatmul.msk.f32.vlgmr.msrb.gmra.mxu2 %vm306_vm1, %v296_v26  ;;  %v590_v26 = vld [vmem:[%s1079_s2] sm:$0xff] }
 0x117   : > { %708 = vmatmul.msk.f32.vlgmr.msrb.gmra.mxu0 %vm306_vm1, %v294_v24 }
 0x11a   : > { %v390_v27 = vpop.permute.xlu0 %389 }
 0x11b   : > { %713 = vmatpush.xpose.msk.msrb.mxu3 %vm306_vm1, %v390_v27 }
 0x11e   : > { %714 = vmatmul.msk.f32.vlgmr.msrb.gmra.mxu3 %vm306_vm1, %v297_v28 }
 0x18c   : > { %v357_v32 = vpop.f32.mrf.mxu1 }
 0x18d   : > { %v419_v33 = vsel %vm302_vm2, %v357_v32, -inf }
 0x18e   : > { %v425_v34 = vsel %vm306_vm1, %v419_v33, -inf }
 0x18f   : > { %426 = vmax.xlane.f32.xlu0 %v425_v34 }
 0x194   : > { %v329_v35 = vpop.f32.mrf.mxu0 }
 0x195   : > { %v418_v36 = vsel %vm302_vm2, %v329_v35, -inf }
 0x196   : > { %v422_v37 = vsel %vm306_vm1, %v418_v36, -inf }
 0x197   : > { %423 = vmax.xlane.f32.xlu1 %v422_v37 }
 0x199   : > { %v385_v38 = vpop.f32.mrf.mxu2 }
 0x19a   : > { %v420_v39 = vsel %vm302_vm2, %v385_v38, -inf }
 0x19b   : > { %v428_v40 = vsel %vm306_vm1, %v420_v39, -inf }
 0x19c   : > { %429 = vmax.xlane.f32.xlu2 %v428_v40 }
 0x1a1   : > { %v413_v41 = vpop.f32.mrf.mxu3 }
 0x1a2   : > { %v421_v42 = vsel %vm302_vm2, %v413_v41, -inf }
 0x1a3   : > { %v431_v43 = vsel %vm306_vm1, %v421_v42, -inf  ;;  %492 = vrot.lane.b32.xlu0 %v251_v17, %s855_s5 }
 0x1a4   : > { %432 = vmax.xlane.f32.xlu2 %v431_v43 }
 0x202   : > { %v427_v44 = vpop.xlane.xlu0 %426 }
 0x203   : > { %v435_v45 = vsub.f32 %v419_v33, %v427_v44 }
 0x205   : > { %v440_v46 = vmul.f32 1.442695, %v435_v45 }
 0x207   : > { %774 = vpow2.f32 %v440_v46 }
 0x20a   : > { %v424_v47 = vpop.xlane.xlu1 %423 }
 0x20b   : > { %v434_v48 = vsub.f32 %v418_v36, %v424_v47 }
 0x20d   : > { %v775_v49 = vpop.eup %774  ;;  %v438_v50 = vmul.f32 1.442695, %v434_v48 }
 0x20e   : > { %v449_v51 = vsel %vm306_vm1, %v775_v49, 0.0 }
 0x20f   : > { %776 = vpow2.f32 %v438_v50  ;;  %v430_v52 = vpop.xlane.xlu2 %429  ;;  %450 = vadd.xlane.f32.xlu2 %v449_v51 }
 0x210   : > { %v436_v53 = vsub.f32 %v420_v39, %v430_v52 }
 0x212   : > { %v442_v54 = vmul.f32 1.442695, %v436_v53 }
 0x214   : > { %778 = vpow2.f32 %v442_v54 }
 0x215   : > { %v777_v55 = vpop.eup %776  ;;  %v493_v56 = vpop.permute.xlu0 %492 }
 0x216   : > { %513 = vmatpush.msra.mxu1 %v493_v56  ;;  %v446_v57 = vsel %vm306_vm1, %v777_v55, 0.0 }
 0x217   : > { %v433_v58 = vpop.xlane.xlu2 %432  ;;  %447 = vadd.xlane.f32.xlu1 %v446_v57 }
 0x218   : > { %v437_v59 = vsub.f32 %v421_v42, %v433_v58 }
 0x21a   : > { %v779_v60 = vpop.eup %778  ;;  %v444_v61 = vmul.f32 1.442695, %v437_v59 }
 0x21b   : > { %v452_v62 = vsel %vm306_vm1, %v779_v60, 0.0 }
 0x21c   : > { %780 = vpow2.f32 %v444_v61  ;;  %453 = vadd.xlane.f32.xlu2 %v452_v62 }
 0x222   : > { %v781_v63 = vpop.eup %780 }
 0x223   : > { %v455_v0 = vsel %vm306_vm1, %v781_v63, 0.0 }
 0x224   : > { %456 = vadd.xlane.f32.xlu2 %v455_v0 }
 0x23c   : > { %769 = vrot.lane.b32.xlu2 %v768_v1, %s855_s5 }
 0x244   : > { %466 = vrot.lane.b32.xlu2 %v992_v19, %s855_s5  ;;  %s633_s5 = scalar_lea.hbm %s1081_s4, %s721_s28 }
 0x245   : > { %s637_s10 = sshll.u32 %s633_s5, 4  ;;  %s638_s10 = int_to_ptr.hbm [resolvable:$true] %s637_s10 }
 0x246   : > { %s804_s19 = sshra.s32 %s638_s10, 4  ;;  %s805_s19 = int_to_ptr.hbm [resolvable:$true] %s804_s19 }
 0x247   : > { %s806_s12 = scalar_lea.hbm %s805_s19, 8  ;;  %p811_p0 = scmp.lt.s32.totalorder %s805_s19, %s1081_s4 }
 0x248   : > { %p807_p11 = scmp.ne.s32.totalorder %s805_s19, %s806_s12  ;;  %p812_p1 = scmp.lt.s32.totalorder %s810_s20, %s806_s12 }
 0x24a   : > { %p808_p12 = pnand %p807_p11, %p922_p5  ;;  %p813_p2 = por %p812_p1, %p811_p0 }
 0x24c   : > { %p809_p13 = pneg %p808_p12 }
 0x24e   : > { %p814_p3 = pnand %p813_p2, %p809_p13 }
 0x282   : > { %v451_v2 = vpop.xlane.xlu2 %450 }
 0x283   : > { %782 = vrcp.f32 %v451_v2 }
 0x289   : > { %v783_v3 = vpop.eup %782 }
 0x28a   : > { %v463_v4 = vmul.f32 %v783_v3, %v775_v49  ;;  %v448_v7 = vpop.xlane.xlu1 %447 }
 0x28c   : > { %716 = vmatmul.msk.f32.vlgmr.msra.gmra.mxu1 %vm306_vm1, %v463_v4 }
 0x28f   : > { %v454_v5 = vpop.xlane.xlu2 %453 }
 0x290   : > { %784 = vrcp.f32 %v454_v5 }
 0x296   : > { %v785_v8 = vpop.eup %784 }
 0x297   : > { %v457_v6 = vpop.xlane.xlu2 %456  ;;  %v464_v13 = vmul.f32 %v785_v8, %v779_v60 }
 0x298   : > { %786 = vrcp.f32 %v457_v6 }
 0x299   : > { %788 = vrcp.f32 %v448_v7 }
 0x29e   : > { %v787_v9 = vpop.eup %786 }
 0x29f   : > { %v770_v10 = vpop.permute.xlu2 %769  ;;  %v465_v14 = vmul.f32 %v787_v9, %v781_v63  ;;  %v789_v15 = vpop.eup %788 }
 0x2a0   : > { %v772_v11 = vunpack.i.h.bf16 %v770_v10  ;;  %v771_v12 = vunpack.i.l.bf16 %v770_v10  ;;  %v462_v16 = vmul.f32 %v789_v15, %v777_v55 }
 0x2a2   : > { %539 = vmatpush.msra.mxu2 %v771_v12  ;;  %565 = vmatpush.msra.mxu3 %v772_v11 }
 0x2a3   : > { %717 = vmatmul.msk.f32.vlgmr.msra.gmra.mxu2 %vm306_vm1, %v464_v13  ;;  %718 = vmatmul.msk.f32.vlgmr.msra.gmra.mxu3 %vm306_vm1, %v465_v14 }
 0x2a7   : > { %v467_v17 = vpop.permute.xlu2 %466 }
 0x2a8   : > { %487 = vmatpush.msra.mxu0 %v467_v17 }
 0x2a9   : > { %715 = vmatmul.msk.f32.vlgmr.msra.gmra.mxu0 %vm306_vm1, %v462_v16 }
 0x2aa   : > { %613 = vmatpush.msrb.mxu0 %v593_v22 }
 0x2ac   : > { %614 = vmatpush.msrb.mxu0 %v592_v23 }
 0x2ae   : > { %615 = vmatpush.msrb.mxu0 %v591_v25 }
 0x2b0   : > { %616 = vmatpush.msrb.mxu0 %v590_v26 }
 0x309   : > { %v515_v18 = vpop.f32.mrf.mxu1 }
 0x30a   : > { %572 = vrot.lane.b32.xlu1 %v515_v18, %s856_s6 }
 0x326   : > { %v489_v19 = vpop.f32.mrf.mxu0  ;;  %v541_v20 = vpop.f32.mrf.mxu2 }
 0x327   : > { %570 = vst.msk [vmem:[#allocation2] sm:$0xff] %vm306_vm1, %v489_v19  ;;  %v567_v21 = vpop.f32.mrf.mxu3  ;;  %578 = vrot.lane.b32.xlu2 %v541_v20, %s857_s7 }
 0x328   : > { %584 = vrot.lane.b32.xlu0 %v567_v21, %s858_s8  ;;  %s188_s8 = scalar_lea.vmem [#allocation3], %s701_s27 }
 0x329   : > { %s635_s9 = sshll.u32 %s188_s8, 4  ;;  %s636_s9 = int_to_ptr.vmem [resolvable:$true] %s635_s9 }
 0x37c   : > { %v573_v24 = vpop.permute.xlu1 %572 }
 0x37d   : > { %576 = vst.msk [vmem:[#allocation2] sm:$0xff] %vm575_vm3, %v573_v24 }
 0x381   : > { %v579_v27 = vpop.permute.xlu2 %578 }
 0x382   : > { %582 = vst.msk [vmem:[#allocation2] sm:$0xff] %vm581_vm4, %v579_v27 }
 0x39a   : > { %v585_v28 = vpop.permute.xlu0 %584 }
 0x39b   : > { %588 = vst.msk [vmem:[#allocation2] sm:$0xff] %vm587_vm5, %v585_v28 }
 0x3a2   : > { %v589_v29 = vld [vmem:[#allocation2] sm:$0xff] }
 0x3a3   : > { %719 = vmatmul.msk.f32.vlgmr.msrb.gmra.mxu0 %vm210_vm0, %v589_v29 }
 0x420   : > { %v618_v31 = vpop.f32.mrf.mxu0 }
 0x421   : > { %v619_v32 = vadd.f32 %v773_v30, %v618_v31 }
 0x423   : > { %621 = vst.msk [vmem:[%s188_s8] sm:$0xff] %vm210_vm0, %v619_v32 }
 0x424   : > { %817 = shalt.err (!%p814_p3)
}
 0x425   : > { %724 = dma.vmem_to_hbm [thread:$0]  (%p922_p5), %s636_s9, 128, %s638_s10, %s623_s11  }
 0x426 PF: > { %p730_p4 = scmp.ge.s32.totalorder %s852_s18, 2  ;;  %s649_s23 = sand.u32 1, %s840_s15  }
 0x427   : > { %s650_s28 = scalar_lea.sflag [#allocation4], %s649_s23 }
 0x428   : > { %p727_p7 = pnand %p730_p4, %p926_p6 }
 0x42a   : > { %p728_p8 = pneg %p727_p7 }
 0x42c   : > { %835 = dma.done.wait (%p728_p8), %s650_s28, 128  }
 0x42d   : > { %837 = vsyncadd (%p728_p8), %s650_s28, 4294967168  ;;  %p14_p9 = scmp.ge.s32.totalorder %s909_s21, 4   ;;  %s1084_s15 = smov %s844_s16 }
 0x42e   : > { %s1085_s16 = smov %s848_s17  ;;  %s1086_s17 = smov %s920_s24 }
 0x42f   : > { %s1087_s18 = smov %s909_s21  ;;  %16 = sbr.rel (!%p14_p9) target bundleno = 3 (0x3), region = 71 }
 0x434   :  { %656 = vsyncpa [#allocation4], 1 }
 0x435   :  { %658 = vsyncpa [#allocation4 + $0x1], 1 }

</bundles_post_ra>
